<compile_context>
chip_gen: v5e
topology: v5e:2x2
jax: 0.10.0
libtpu: 0.0.40
codegen_flags: <defaults>
</compile_context>

<pallas_src>
import functools

import jax
import jax.numpy as jnp
from jax import lax
from jax.experimental import pallas as pl
from jax.experimental.pallas import tpu as pltpu


def _stn_kernel(xy_ref, x_ref, o_ref, *, C, H, W, chunk, unroll):
    """One (batch, p-tile) grid step.

    xy_ref: (1, 2, TP)    f32  row 0 = sample x (col), row 1 = sample y (row)
    x_ref:  (1, C*H, W)   bf16 flattened source image (resident across tiles)
    o_ref:  (1, C, TP)    f32  warped output tile
    """
    TP = o_ref.shape[2]
    n_chunks = TP // chunk
    x_flat = x_ref[0]                                        # (C*H, W) bf16

    def body(ci, carry):
        off = pl.multiple_of(ci * chunk, chunk)

        # Sample coordinates for this 'chunk' of output pixels (f32 — never
        # cast coordinates to bf16).
        ix = xy_ref[0, 0:1, pl.ds(off, chunk)]               # (1, chunk)
        iy = xy_ref[0, 1:2, pl.ds(off, chunk)]               # (1, chunk)

        # Separable tent weights built on small slabs. Samples outside
        # [0, W-1] x [0, H-1] get zero weight against every valid source
        # pixel -> reproduces padding_mode='zeros'.
        qc = lax.broadcasted_iota(jnp.int32, (W, chunk), 0).astype(jnp.float32)
        qr = lax.broadcasted_iota(jnp.int32, (H, chunk), 0).astype(jnp.float32)
        wx = jnp.maximum(0.0, 1.0 - jnp.abs(ix - qc))        # (W, chunk) f32
        wy = jnp.maximum(0.0, 1.0 - jnp.abs(iy - qr))        # (H, chunk) f32

        # Stage 1 (MXU): contract over W. Weights are in [0,1] -> safe bf16.
        tmp = jnp.dot(x_flat, wx.astype(jnp.bfloat16),
                      preferred_element_type=jnp.float32)    # (C*H, chunk) f32

        # Stage 2 (VPU + XLU): weight rows by wy and reduce over H.
        tmp3 = tmp.reshape(C, H, chunk)
        out = jnp.sum(tmp3 * wy[None, :, :], axis=1)         # (C, chunk) f32

        o_ref[0, :, pl.ds(off, chunk)] = out
        return carry

    lax.fori_loop(0, n_chunks, body, 0, unroll=unroll)


def stn_forward(inputs, flow, gain=1.0, normalize=False):
    """inputs: (N, C, H, W) float; flow: (N, 2, H, W) float (u, v)."""
    N, C, H, W = inputs.shape
    assert flow.shape == (N, 2, H, W), "optical flow must have 2 channels"
    P = H * W

    # Flow -> pixel-displacement scale (identical to the PyTorch module):
    #   not normalized: grid += (flow / {W,H}) * 2 * gain -> pixels: gain*(d-1)/d
    #   normalized:     grid += flow * gain               -> pixels: gain*(d-1)/2
    if normalize:
        sx = gain * (W - 1) / 2.0
        sy = gain * (H - 1) / 2.0
    else:
        sx = gain * (W - 1) / float(W)
        sy = gain * (H - 1) / float(H)

    # Sample coordinates in pixel units (align_corners=True), f32, merged into
    # a single small per-batch input (one DMA per grid step).
    jj = jnp.arange(W, dtype=jnp.float32)[None, None, :]
    ii = jnp.arange(H, dtype=jnp.float32)[None, :, None]
    ix = (jj + flow[:, 0].astype(jnp.float32) * sx).reshape(N, 1, P)
    iy = (ii + flow[:, 1].astype(jnp.float32) * sy).reshape(N, 1, P)
    xy = jnp.concatenate([ix, iy], axis=1)                   # (N, 2, P) f32

    # Pad the output-pixel axis to a lane multiple; sentinel coords (-2) give
    # all-zero weights -> zero output in the padded region.
    P_pad = ((P + 127) // 128) * 128
    if P_pad != P:
        xy = jnp.pad(xy, ((0, 0), (0, 0), (0, P_pad - P)), constant_values=-2.0)

    # Pad image rows to a sublane multiple; zero rows contribute nothing.
    H_pad = ((H + 7) // 8) * 8
    x_bf = inputs.astype(jnp.bfloat16)                       # cast once, wrapper
    if H_pad != H:
        x_bf = jnp.pad(x_bf, ((0, 0), (0, 0), (0, H_pad - H), (0, 0)))
    x_flat = x_bf.reshape(N, C * H_pad, W)                   # stage-1 LHS

    # Tile / chunk selection.
    TP = next(tp for tp in (1024, 512, 256, 128) if P_pad % tp == 0)
    chunk = 256 if TP % 256 == 0 else 128
    n_chunks = TP // chunk

    # Per-chunk temp footprint (wx/wy + stage-1/2 slabs, f32 with slack) ->
    # bounded unroll so temps stay under ~2 MiB even for large C*H.
    per_chunk = (W + H_pad) * chunk * 4 * 2 + C * H_pad * chunk * 4 * 3
    unroll = int(max(1, min(n_chunks, (2 * 2 ** 20) // max(per_chunk, 1))))

    kernel = functools.partial(_stn_kernel, C=C, H=H_pad, W=W,
                               chunk=chunk, unroll=unroll)

    est = (2 * C * H_pad * W * 2          # image bf16, double-buffered
           + 2 * 2 * TP * 4               # xy tile, double-buffered
           + 2 * C * TP * 4               # out tile, double-buffered
           + unroll * per_chunk)          # in-kernel temps
    vmem_limit = int(min(max(2 * est, 16 * 2 ** 20), 48 * 2 ** 20))

    cost = pl.CostEstimate(
        flops=int(2 * N * C * H_pad * W * P_pad + 2 * N * C * H_pad * P_pad),
        transcendentals=0,
        bytes_accessed=int(N * (C * H_pad * W * 2 + 2 * P_pad * 4
                                + C * P_pad * 4)),
    )

    out_flat = pl.pallas_call(
        kernel,
        out_shape=jax.ShapeDtypeStruct((N, C, P_pad), jnp.float32),
        grid_spec=pltpu.PrefetchScalarGridSpec(
            num_scalar_prefetch=0,
            grid=(N, P_pad // TP),
            in_specs=[
                pl.BlockSpec((1, 2, TP), lambda b, pt: (b, 0, pt)),          # coords
                pl.BlockSpec((1, C * H_pad, W), lambda b, pt: (b, 0, 0)),    # image
            ],
            out_specs=pl.BlockSpec((1, C, TP), lambda b, pt: (b, 0, pt)),
        ),
        compiler_params=pltpu.CompilerParams(
            dimension_semantics=("parallel", "parallel"),
            vmem_limit_bytes=vmem_limit,
        ),
        cost_estimate=cost,
    )(xy, x_flat)

    return out_flat[:, :, :P].reshape(N, C, H, W)


def stn_reference(inputs, flow, gain=1.0, normalize=False):
    """Pure-JAX reference of F.grid_sample(bilinear, zeros, align_corners=True)
    applied to identity-grid + flow (matching the PyTorch STN module)."""
    N, C, H, W = inputs.shape
    u = flow[:, 0]
    v = flow[:, 1]
    if normalize:
        sx = gain * (W - 1) / 2.0
        sy = gain * (H - 1) / 2.0
    else:
        sx = gain * (W - 1) / float(W)
        sy = gain * (H - 1) / float(H)
    jj = jnp.arange(W, dtype=jnp.float32)[None, None, :]
    ii = jnp.arange(H, dtype=jnp.float32)[None, :, None]
    ix = jj + u * sx    # (N, H, W)
    iy = ii + v * sy
    x0 = jnp.floor(ix)
    y0 = jnp.floor(iy)
    b_idx = jnp.arange(N)[:, None, None, None]
    c_idx = jnp.arange(C)[None, :, None, None]
    out = jnp.zeros((N, C, H, W), jnp.float32)
    for dx in (0, 1):
        for dy in (0, 1):
            xc = x0 + dx
            yc = y0 + dy
            w = jnp.maximum(0.0, 1.0 - jnp.abs(ix - xc)) * \
                jnp.maximum(0.0, 1.0 - jnp.abs(iy - yc))
            inb = (xc >= 0) & (xc <= W - 1) & (yc >= 0) & (yc <= H - 1)
            xi = jnp.clip(xc, 0, W - 1).astype(jnp.int32)
            yi = jnp.clip(yc, 0, H - 1).astype(jnp.int32)
            vals = inputs[b_idx, c_idx, yi[:, None], xi[:, None]]
            out = out + jnp.where(inb[:, None], w[:, None] * vals, 0.0)
    return out


if __name__ == "__main__":
    key = jax.random.PRNGKey(0)
    k1, k2 = jax.random.split(key)
    N, C, H, W = 2, 4, 16, 16
    x = jax.random.normal(k1, (N, C, H, W), dtype=jnp.float32)
    # Flow in pixel-ish units (module divides by W/H and doubles internally).
    flow = jax.random.normal(k2, (N, 2, H, W), dtype=jnp.float32) * 3.0

    out = stn_forward(x, flow, gain=1.0, normalize=False)
    out = jax.block_until_ready(out)

    ref = stn_reference(x, flow, gain=1.0, normalize=False)
    assert out.shape == (N, C, H, W)
    # bf16 MXU operands (f32 accumulate) -> relaxed tolerance vs the f32 ref.
    assert jnp.allclose(out, ref, atol=5e-2, rtol=5e-2), \
        f"max err {jnp.max(jnp.abs(out - ref))}"

    print("KERNEL_OK")
</pallas_src>

<mosaic_0001>
module attributes {stable_mosaic.version = 11 : i64} {
  func.func @_stn_kernel(%arg0: i32, %arg1: i32, %arg2: memref<1x2x256xf32, #tpu.memory_space<vmem>>, %arg3: memref<1x64x16xbf16, #tpu.memory_space<vmem>>, %arg4: memref<1x4x256xf32, #tpu.memory_space<vmem>>) attributes {dimension_semantics = [#tpu.dimension_semantics<parallel>, #tpu.dimension_semantics<parallel>], iteration_bounds = array<i64: 2, 1>, scalar_prefetch = 0 : i64, scratch_operands = 0 : i64, tpu.core_type = #tpu.core_type<tc>, window_params = [{transform_indices = @transform_0, window_bounds = array<i64: 1, 2, 256>}, {transform_indices = @transform_1, window_bounds = array<i64: 1, 64, 16>}, {transform_indices = @transform_2, window_bounds = array<i64: 1, 4, 256>}]} {
    %c0 = arith.constant 0 : index
    %c0_0 = arith.constant 0 : index
    %c0_1 = arith.constant 0 : index
    %0 = vector.load %arg3[%c0, %c0_0, %c0_1] : memref<1x64x16xbf16, #tpu.memory_space<vmem>>, vector<1x64x16xbf16>
    %1 = vector.shape_cast %0 : vector<1x64x16xbf16> to vector<64x16xbf16>
    %c0_i32 = arith.constant 0 : i32
    %c256_i32 = arith.constant 256 : i32
    %2 = arith.muli %c0_i32, %c256_i32 : i32
    %3 = tpu.assume_multiple %2, 256 : i32
    %c0_2 = arith.constant 0 : index
    %c0_3 = arith.constant 0 : index
    %4 = arith.index_cast %3 : i32 to index
    %5 = vector.load %arg2[%c0_2, %c0_3, %4] : memref<1x2x256xf32, #tpu.memory_space<vmem>>, vector<1x1x256xf32>
    %6 = vector.shape_cast %5 : vector<1x1x256xf32> to vector<1x256xf32>
    %c0_4 = arith.constant 0 : index
    %c1 = arith.constant 1 : index
    %7 = arith.index_cast %3 : i32 to index
    %8 = vector.load %arg2[%c0_4, %c1, %7] : memref<1x2x256xf32, #tpu.memory_space<vmem>>, vector<1x1x256xf32>
    %9 = vector.shape_cast %8 : vector<1x1x256xf32> to vector<1x256xf32>
    %10 = tpu.iota {dimensions = array<i32: 0>} : vector<16x256xi32>
    %11 = arith.sitofp %10 : vector<16x256xi32> to vector<16x256xf32>
    %12 = tpu.iota {dimensions = array<i32: 0>} : vector<16x256xi32>
    %13 = arith.sitofp %12 : vector<16x256xi32> to vector<16x256xf32>
    %14 = vector.broadcast %6 : vector<1x256xf32> to vector<16x256xf32>
    %15 = arith.subf %14, %11 : vector<16x256xf32>
    %16 = math.absf %15 : vector<16x256xf32>
    %cst = arith.constant 1.000000e+00 : f32
    %17 = vector.broadcast %cst : f32 to vector<16x256xf32>
    %18 = arith.subf %17, %16 : vector<16x256xf32>
    %cst_5 = arith.constant 0.000000e+00 : f32
    %19 = vector.broadcast %cst_5 : f32 to vector<16x256xf32>
    %20 = arith.maximumf %19, %18 : vector<16x256xf32>
    %21 = vector.broadcast %9 : vector<1x256xf32> to vector<16x256xf32>
    %22 = arith.subf %21, %13 : vector<16x256xf32>
    %23 = math.absf %22 : vector<16x256xf32>
    %cst_6 = arith.constant 1.000000e+00 : f32
    %24 = vector.broadcast %cst_6 : f32 to vector<16x256xf32>
    %25 = arith.subf %24, %23 : vector<16x256xf32>
    %cst_7 = arith.constant 0.000000e+00 : f32
    %26 = vector.broadcast %cst_7 : f32 to vector<16x256xf32>
    %27 = arith.maximumf %26, %25 : vector<16x256xf32>
    %28 = arith.truncf %20 : vector<16x256xf32> to vector<16x256xbf16>
    %cst_8 = arith.constant dense<0.000000e+00> : vector<64x256xf32>
    %29 = tpu.matmul %1, %28, %cst_8 {dimension_numbers = #tpu.dot_dimension_numbers<[1], [0], [0], [1], [0, 0, 1, 1], [], []>} : vector<64x16xbf16>, vector<16x256xbf16>, vector<64x256xf32> -> vector<64x256xf32>
    %30 = vector.shape_cast %29 : vector<64x256xf32> to vector<4x16x256xf32>
    %31 = vector.shape_cast %27 : vector<16x256xf32> to vector<1x16x256xf32>
    %32 = vector.broadcast %31 : vector<1x16x256xf32> to vector<4x16x256xf32>
    %33 = arith.mulf %30, %32 : vector<4x16x256xf32>
    %cst_9 = arith.constant dense<0.000000e+00> : vector<4x256xf32>
    %34 = vector.multi_reduction <add>, %33, %cst_9 [1] : vector<4x16x256xf32> to vector<4x256xf32>
    %c0_10 = arith.constant 0 : index
    %c0_11 = arith.constant 0 : index
    %35 = arith.index_cast %3 : i32 to index
    %36 = vector.load %arg4[%c0_10, %c0_11, %35] : memref<1x4x256xf32, #tpu.memory_space<vmem>>, vector<1x4x256xf32>
    %37 = vector.shape_cast %36 : vector<1x4x256xf32> to vector<4x256xf32>
    %38 = vector.shape_cast %34 : vector<4x256xf32> to vector<1x4x256xf32>
    tpu.vector_store %arg4[%c0_10, %c0_11, %35], %38 {strides = array<i32>} : memref<1x4x256xf32, #tpu.memory_space<vmem>>, vector<1x4x256xf32>,
    %c1_i32 = arith.constant 1 : i32
    return
  }
  func.func @transform_0(%arg0: i32, %arg1: i32) -> (i32, i32, i32) {
    %c0_i32 = arith.constant 0 : i32
    %c0_i32_0 = arith.constant 0 : i32
    return %arg0, %c0_i32, %arg1 : i32, i32, i32
  }
  func.func @transform_1(%arg0: i32, %arg1: i32) -> (i32, i32, i32) {
    %c0_i32 = arith.constant 0 : i32
    %c0_i32_0 = arith.constant 0 : i32
    %c0_i32_1 = arith.constant 0 : i32
    return %arg0, %c0_i32, %c0_i32_0 : i32, i32, i32
  }
  func.func @transform_2(%arg0: i32, %arg1: i32) -> (i32, i32, i32) {
    %c0_i32 = arith.constant 0 : i32
    %c0_i32_0 = arith.constant 0 : i32
    return %arg0, %c0_i32, %arg1 : i32, i32, i32
  }
}

</mosaic_0001>

<bundles_post_ra>
// kernel: tpu_custom_call.1
= control target key start
LH: loop header
LB: loop body
LE: loop exit
PB: predicated region body
PF: predicated region fallthrough
CT: control target
= control target key end

     0   :  { %7 = vsyncpa [#allocation3], 0  ;;  %s872_s0 = inlined_call_operand.vmem [shape: f32[2,2,256], index: 0, kind: input, shape index: {}]   ;;  %s873_s1 = inlined_call_operand.vmem [shape: bf16[2,64,16], index: 1, kind: input, shape index: {}]   ;;  %s874_s2 = inlined_call_operand.hbm [shape: f32[2,4,256], index: 2, kind: output, shape index: {}]  }
   0x1   :  { %9 = vsyncpa [#allocation3 + $0x1], 0  ;;  %s757_s9 = smov 0   ;;  %s759_s10 = smov 0  }
   0x2   :  { %s761_s11 = smov 0   ;;  %s763_s12 = smov 0  }
   0x3   :  { %s765_s13 = smov 0   ;;  %s767_s14 = smov 0  }
   0x4 LB: > { %s558_s15 = sadd.s32 4294967295, %s740_s14   ;;  %s559_s16 = sadd.s32 4294967294, %s740_s14   ;;  %s740_s14 = sphi %s767_s14, %s15_s14   ;;  %s736_s13 = sphi %s765_s13, %s881_s13   ;;  %s732_s12 = sphi %s763_s12, %s880_s12   ;;  %s728_s11 = sphi %s761_s11, %s879_s11   ;;  %s724_s10 = sphi %s759_s10, %s878_s10   ;;  %s720_s9 = sphi %s757_s9, %s877_s9  }
   0x5   : > { %s27_s17 = sadd.s32 1, %s736_s13  ;;  %s90_s18 = sadd.s32 1, %s728_s11 }
   0x6   : > { %p29_p0 = scmp.ge.s32.totalorder %s27_s17, 2  ;;  %p100_p1 = scmp.ne.s32.totalorder %s728_s11, %s724_s10 }
   0x7   : > { %p101_p2 = scmp.eq.s32.totalorder %s558_s15, 1  ;;  %p106_p3 = scmp.ne.s32.totalorder %s724_s10, %s720_s9 }
   0x8   : > { %s883_s17 = smov (%p29_p0, %s27_s17), 0  ;;  %p107_p5 = scmp.eq.s32.totalorder %s559_s16, 1 }
   0x9   : > { %p797_p4 = por %p101_p2, %p100_p1  ;;  %s85_s20 = ssub.s32 %s736_s13, %s883_s17 }
   0xa   : > { %p562_p6 = scmp.ge.s32.totalorder %s740_s14, 1  ;;  %p88_p7 = scmp.eq.s32.totalorder %s85_s20, 0 }
   0xb   : > { %p804_p8 = por %p107_p5, %p106_p3  ;;  %p146_p9 = scmp.lt.s32.totalorder %s740_s14, 3 }
   0xc   : > { %s810_s22 = scalar_select %p88_p7, %s728_s11, %s90_s18  }
   0xd   : > { %p147_p10 = pnand %p562_p6, %p146_p9 }
   0xe   : > { %p178_p11 = scmp.lt.s32.totalorder (!%p147_p10), %s732_s12, 1  ;;  %s174_s4 = sand.u32 (!%p147_p10), 1, %s724_s10  }
   0xf   : > { %150 = sbr.rel (%p147_p10) target bundleno = 224 (0xe0), region = 28  ;;  %s827_s5 = sshll.u32 (!%p147_p10), %s174_s4, 3 }
  0x10   : > { %s604_s6 = sshll.u32 (!%p147_p10), %s732_s12, 3  ;;  %s452_s20 = scalar_lea.sflag (!%p147_p10), [#allocation3], %s174_s4 }
  0x11   : > { %s465_s15 = scalar_lea.hbm (!%p147_p10), %s874_s2, %s604_s6 }
  0x12   : > { %s469_s18 = sshll.u32 (!%p147_p10), %s465_s15, 4  ;;  %s470_s18 = int_to_ptr.hbm [resolvable:$true] %s469_s18 }
  0x14   : > { %v205_v0 = vlaneseq  ;;  %s179_s23 = scalar_select %p178_p11, %s732_s12, 1  ;;  %vm274_vm0 = vcmask 130048   ;;  %vm429_vm1 = vcmask 1043456   ;;  %vm435_vm2 = vcmask 1041409  }
  0x15   : > { %vm437_vm3 = vcmask 1045509   ;;  %vm440_vm4 = vcmask 1042434   ;;  %vm442_vm5 = vcmask 1046534   ;;  %vm445_vm6 = vcmask 1043459   ;;  %s176_s12 = scalar_lea.vmem [#allocation2], %s827_s5 }
  0x16   : > { %v206_v1 = vshrl.u32 %v205_v0, 7  ;;  %s598_s24 = sshll.u32 %s179_s23, 2  ;;  %s599_s28 = sshll.u32 %s179_s23, 5  ;;  %vm447_vm7 = vcmask 1047559  }
  0x17   : > { %s817_s27 = scalar_lea.vmem %s872_s0, %s598_s24  ;;  %s191_s3 = scalar_lea.vmem %s873_s1, %s599_s28 }
  0x18   : > { %v207_v2 = vadd.s32 8, %v206_v1  ;;  %v208_v3 = vcvt.s32.f32 %v206_v1  ;;  %v202_v4 = vld [vmem:[%s817_s27] ss:$2 sm:$0x3]  ;;  %v602_v27 = vld [vmem:[%s191_s3 + $0x10] sm:$0xff]  ;;  %v601_v28 = vld [vmem:[%s191_s3 + $0x8] sm:$0xff] }
  0x19   : > { %v211_v6 = vperm.slane %v202_v4, 0  ;;  %v212_v7 = vperm.slane %v202_v4, 1  ;;  %v600_v26 = vld [vmem:[%s191_s3] sm:$0xff]  ;;  %v603_v29 = vld [vmem:[%s191_s3 + $0x18] sm:$0xff]  ;;  %s467_s16 = sshll.u32 %s176_s12, 4  ;;  %s676_s23 = sshra.s32 %s470_s18, 4  ;;  %s468_s16 = int_to_ptr.vmem [resolvable:$true] %s467_s16  ;;  %s677_s23 = int_to_ptr.hbm [resolvable:$true] %s676_s23 }
  0x1a   : > { %v209_v5 = vcvt.s32.f32 %v207_v2  ;;  %v568_v30 = vld [vmem:[%s817_s27 + $0x1] ss:$2 sm:$0x3]  ;;  %s678_s24 = scalar_lea.hbm %s677_s23, 8  ;;  %s682_s27 = scalar_lea.hbm %s874_s2, 16 }
  0x1b   : > { %v215_v8 = vsub.f32 %v211_v6, %v208_v3  ;;  %v216_v10 = vsub.f32 %v212_v7, %v208_v3  ;;  %v233_v31 = vperm.slane %v568_v30, 1  ;;  %v232_v34 = vperm.slane %v568_v30, 0  ;;  %p679_p12 = scmp.ne.s32.totalorder %s677_s23, %s678_s24  ;;  %p683_p1 = scmp.lt.s32.totalorder %s677_s23, %s874_s2 }
  0x1c   : > { %v217_v9 = vsub.f32 %v211_v6, %v209_v5  ;;  %v218_v11 = vsub.f32 %v212_v7, %v209_v5  ;;  %p684_p2 = scmp.lt.s32.totalorder %s682_s27, %s678_s24 }
  0x1d   : > { %v219_v12 = vand.u32 2147483647, %v215_v8  ;;  %v220_v14 = vand.u32 2147483647, %v216_v10  ;;  %v239_v32 = vsub.f32 %v233_v31, %v209_v5  ;;  %v237_v33 = vsub.f32 %v233_v31, %v208_v3  ;;  %p680_p13 = pnand %p679_p12, %p797_p4 }
  0x1e   : > { %v221_v13 = vand.u32 2147483647, %v217_v9  ;;  %v222_v15 = vand.u32 2147483647, %v218_v11  ;;  %v238_v37 = vsub.f32 %v232_v34, %v209_v5  ;;  %v236_v39 = vsub.f32 %v232_v34, %v208_v3  ;;  %p685_p3 = por %p684_p2, %p683_p1 }
  0x1f   : > { %v223_v16 = vsub.f32 1.0, %v219_v12  ;;  %v224_v18 = vsub.f32 1.0, %v220_v14  ;;  %v243_v35 = vand.u32 2147483647, %v239_v32  ;;  %v241_v36 = vand.u32 2147483647, %v237_v33  ;;  %p681_p0 = pneg %p680_p13 }
  0x20   : > { %v225_v17 = vsub.f32 1.0, %v221_v13  ;;  %v226_v19 = vsub.f32 1.0, %v222_v15  ;;  %v242_v43 = vand.u32 2147483647, %v238_v37  ;;  %v240_v44 = vand.u32 2147483647, %v236_v39 }
  0x21   : > { %v227_v20 = vmax.f32 %v223_v16, 0.0  ;;  %v228_v22 = vmax.f32 %v224_v18, 0.0  ;;  %v247_v41 = vsub.f32 1.0, %v243_v35  ;;  %v245_v42 = vsub.f32 1.0, %v241_v36  ;;  %p686_p5 = pnand %p685_p3, %p681_p0 }
  0x22   : > { %v229_v21 = vmax.f32 %v225_v17, 0.0  ;;  %v230_v23 = vmax.f32 %v226_v19, 0.0  ;;  %v246_v49 = vsub.f32 1.0, %v242_v43  ;;  %v244_v51 = vsub.f32 1.0, %v240_v44 }
  0x23   : > { %v251_v46 = vmax.f32 %v247_v41, 0.0  ;;  %v249_v47 = vmax.f32 %v245_v42, 0.0 }
  0x24   : > { %v252_v24 = vpack.c.bf16 %v229_v21, %v227_v20  ;;  %v253_v25 = vpack.c.bf16 %v230_v23, %v228_v22  ;;  %v250_v55 = vmax.f32 %v246_v49, 0.0  ;;  %v248_v56 = vmax.f32 %v244_v51, 0.0 }
  0x26   : > { %294 = vmatpush.bf16.msra.mxu0 %v252_v24  ;;  %605 = vmatpush.bf16.msra.mxu2 %v252_v24 }
  0x27   : > { %323 = vmatpush.bf16.msra.mxu1 %v253_v25  ;;  %606 = vmatpush.bf16.msra.mxu3 %v253_v25 }
  0x29   : > { %585 = vmatmul.msk.bf16.vlgmr.msra.gmra.mxu0 %vm274_vm0, %v600_v26  ;;  %587 = vmatmul.msk.bf16.vlgmr.msra.gmra.mxu2 %vm274_vm0, %v602_v27 }
  0x2a   : > { %589 = vmatmul.msk.bf16.vlgmr.msra.gmra.mxu1 %vm274_vm0, %v600_v26  ;;  %591 = vmatmul.msk.bf16.vlgmr.msra.gmra.mxu3 %vm274_vm0, %v602_v27 }
  0x39   : > { %586 = vmatmul.msk.bf16.gmra.mxu0 %vm274_vm0, %v601_v28  ;;  %588 = vmatmul.msk.bf16.gmra.mxu2 %vm274_vm0, %v603_v29 }
  0x3a   : > { %590 = vmatmul.msk.bf16.gmra.mxu1 %vm274_vm0, %v601_v28  ;;  %592 = vmatmul.msk.bf16.gmra.mxu3 %vm274_vm0, %v603_v29 }
  0xa6   : > { %v296_v38 = vpop.f32.mrf.mxu0 }
  0xa7   : > { %v325_v40 = vpop.f32.mrf.mxu1  ;;  %v345_v2 = vmul.f32 %v296_v38, %v248_v56 }
  0xa8   : > { %v346_v54 = vmul.f32 %v325_v40, %v249_v47 }
  0xac   : > { %v306_v45 = vpop.f32.mrf.mxu2 }
  0xad   : > { %v335_v48 = vpop.f32.mrf.mxu3  ;;  %v353_v62 = vmul.f32 %v306_v45, %v248_v56 }
  0xae   : > { %v298_v50 = vpop.f32.mrf.mxu0  ;;  %v354_v63 = vmul.f32 %v335_v48, %v249_v47 }
  0xaf   : > { %v327_v52 = vpop.f32.mrf.mxu1  ;;  %v347_v59 = vmul.f32 %v298_v50, %v250_v55 }
  0xb0   : > { %v348_v53 = vmul.f32 %v327_v52, %v251_v46 }
  0xb1   : > { %v361_v7 = vadd.f32 %v347_v59, %v345_v2 }
  0xb2   : > { %v368_v57 = vadd.f32 %v348_v53, %v346_v54 }
  0xb3   : > { %v362_v13 = vrot.slane %v361_v7, 4 }
  0xb4   : > { %v308_v58 = vpop.f32.mrf.mxu2  ;;  %v369_v3 = vrot.slane %v368_v57, 4 }
  0xb5   : > { %v355_v60 = vmul.f32 %v308_v58, %v250_v55  ;;  %v337_v61 = vpop.f32.mrf.mxu3  ;;  %v363_v24 = vadd.f32 %v362_v13, %v361_v7 }
  0xb6   : > { %v356_v0 = vmul.f32 %v337_v61, %v251_v46  ;;  %v301_v1 = vpop.f32.mrf.mxu0  ;;  %v370_v9 = vadd.f32 %v369_v3, %v368_v57 }
  0xb7   : > { %v330_v4 = vpop.f32.mrf.mxu1  ;;  %v389_v5 = vadd.f32 %v355_v60, %v353_v62  ;;  %v349_v18 = vmul.f32 %v301_v1, %v248_v56  ;;  %v364_v33 = vrot.slane %v363_v24, 2 }
  0xb8   : > { %v396_v6 = vadd.f32 %v356_v0, %v354_v63  ;;  %v371_v17 = vrot.slane %v370_v9, 2  ;;  %v350_v22 = vmul.f32 %v330_v4, %v249_v47 }
  0xb9   : > { %v390_v10 = vrot.slane %v389_v5, 4  ;;  %v365_v50 = vadd.f32 %v364_v33, %v363_v24 }
  0xba   : > { %v397_v8 = vrot.slane %v396_v6, 4  ;;  %v372_v28 = vadd.f32 %v371_v17, %v370_v9 }
  0xbb   : > { %v391_v21 = vadd.f32 %v390_v10, %v389_v5 }
  0xbc   : > { %v398_v11 = vadd.f32 %v397_v8, %v396_v6  ;;  %v311_v12 = vpop.f32.mrf.mxu2  ;;  %v373_v42 = vrot.slane %v372_v28, 1 }
  0xbd   : > { %v340_v14 = vpop.f32.mrf.mxu3  ;;  %v392_v30 = vrot.slane %v391_v21, 2  ;;  %v357_v34 = vmul.f32 %v311_v12, %v248_v56 }
  0xbe   : > { %v399_v15 = vrot.slane %v398_v11, 2  ;;  %v303_v16 = vpop.f32.mrf.mxu0  ;;  %v358_v39 = vmul.f32 %v340_v14, %v249_v47  ;;  %v374_v57 = vadd.f32 %v373_v42, %v372_v28 }
  0xbf   : > { %v351_v19 = vmul.f32 %v303_v16, %v250_v55  ;;  %v332_v20 = vpop.f32.mrf.mxu1  ;;  %v393_v45 = vadd.f32 %v392_v30, %v391_v21 }
  0xc0   : > { %v352_v23 = vmul.f32 %v332_v20, %v251_v46  ;;  %v400_v26 = vadd.f32 %v399_v15, %v398_v11  ;;  %v425_v1 = vrot.slane %v374_v57, 4 }
  0xc1   : > { %v375_v25 = vadd.f32 %v351_v19, %v349_v18  ;;  %v394_v58 = vrot.slane %v393_v45, 1 }
  0xc2   : > { %v382_v27 = vadd.f32 %v352_v23, %v350_v22  ;;  %v401_v38 = vrot.slane %v400_v26, 1 }
  0xc3   : > { %v376_v29 = vrot.slane %v375_v25, 4  ;;  %v395_v3 = vadd.f32 %v394_v58, %v393_v45 }
  0xc4   : > { %v383_v31 = vrot.slane %v382_v27, 4  ;;  %v313_v32 = vpop.f32.mrf.mxu2  ;;  %v402_v53 = vadd.f32 %v401_v38, %v400_v26 }
  0xc5   : > { %v377_v35 = vadd.f32 %v376_v29, %v375_v25  ;;  %v359_v36 = vmul.f32 %v313_v32, %v250_v55  ;;  %v342_v37 = vpop.f32.mrf.mxu3 }
  0xc6   : > { %v384_v40 = vadd.f32 %v383_v31, %v382_v27  ;;  %v360_v41 = vmul.f32 %v342_v37, %v251_v46  ;;  %v366_v46 = vrot.slane %v365_v50, 1  ;;  %v427_v62 = vrot.slane %v402_v53, 4 }
  0xc7   : > { %v378_v43 = vrot.slane %v377_v35, 2  ;;  %v403_v44 = vadd.f32 %v359_v36, %v357_v34 }
  0xc8   : > { %v385_v48 = vrot.slane %v384_v40, 2  ;;  %v410_v49 = vadd.f32 %v360_v41, %v358_v39  ;;  %v367_v7 = vadd.f32 %v366_v46, %v365_v50  ;;  %v432_v11 = vsel %vm429_vm1, %v395_v3, %v427_v62 }
  0xc9   : > { %v379_v51 = vadd.f32 %v378_v43, %v377_v35  ;;  %v404_v52 = vrot.slane %v403_v44, 4  ;;  %v439_v16 = vrot.slane %v432_v11, 6 }
  0xca   : > { %v386_v54 = vadd.f32 %v385_v48, %v384_v40  ;;  %v411_v56 = vrot.slane %v410_v49, 4  ;;  %v430_v14 = vsel %vm429_vm1, %v367_v7, %v425_v1 }
  0xcb   : > { %v405_v55 = vadd.f32 %v404_v52, %v403_v44  ;;  %v380_v59 = vrot.slane %v379_v51, 1 }
  0xcc   : > { %v387_v47 = vrot.slane %v386_v54, 1  ;;  %v412_v60 = vadd.f32 %v411_v56, %v410_v49 }
  0xcd   : > { %v406_v61 = vrot.slane %v405_v55, 2  ;;  %v381_v4 = vadd.f32 %v380_v59, %v379_v51 }
  0xce   : > { %v388_v63 = vadd.f32 %v387_v47, %v386_v54  ;;  %v413_v0 = vrot.slane %v412_v60, 2 }
  0xcf   : > { %v407_v2 = vadd.f32 %v406_v61, %v405_v55 }
  0xd0   : > { %v426_v5 = vrot.slane %v388_v63, 4  ;;  %v414_v6 = vadd.f32 %v413_v0, %v412_v60 }
  0xd1   : > { %v408_v8 = vrot.slane %v407_v2, 1 }
  0xd2   : > { %v415_v9 = vrot.slane %v414_v6, 1  ;;  %v431_v10 = vsel %vm429_vm1, %v381_v4, %v426_v5 }
  0xd3   : > { %v434_v12 = vrot.slane %v431_v10, 7  ;;  %v409_v17 = vadd.f32 %v408_v8, %v407_v2 }
  0xd4   : > { %v416_v13 = vadd.f32 %v415_v9, %v414_v6 }
  0xd5   : > { %v436_v15 = vsel %vm435_vm2, %v434_v12, %v430_v14 }
  0xd6   : > { %v428_v18 = vrot.slane %v416_v13, 4  ;;  %v438_v19 = vsel %vm437_vm3, %v434_v12, %v436_v15 }
  0xd7   : > { %v441_v20 = vsel %vm440_vm4, %v439_v16, %v438_v19 }
  0xd8   : > { %v433_v21 = vsel %vm429_vm1, %v409_v17, %v428_v18  ;;  %v443_v23 = vsel %vm442_vm5, %v439_v16, %v441_v20 }
  0xd9   : > { %v444_v22 = vrot.slane %v433_v21, 5 }
  0xdb   : > { %v446_v24 = vsel %vm445_vm6, %v444_v22, %v443_v23 }
  0xdc   : > { %v448_v25 = vsel %vm447_vm7, %v444_v22, %v446_v24 }
  0xdd   : > { %450 = vst [vmem:[%s176_s12] sm:$0xff] %v448_v25 }
  0xde   : > { %689 = shalt.err (!%p686_p5)
}
  0xdf   : > { %607 = dma.vmem_to_hbm [thread:$0]  (%p797_p4), %s468_s16, 128, %s470_s18, %s452_s20  }
  0xe0 PF: > { %p613_p6 = scmp.ge.s32.totalorder %s740_s14, 2  ;;  %s481_s30 = sand.u32 1, %s720_s9  }
  0xe1   : > { %s482_s3 = scalar_lea.sflag [#allocation3], %s481_s30 }
  0xe2   : > { %p610_p7 = pnand %p613_p6, %p804_p8 }
  0xe4   : > { %p611_p9 = pneg %p610_p7 }
  0xe6   : > { %715 = dma.done.wait (%p611_p9), %s482_s3, 128  }
  0xe7   : > { %717 = vsyncadd (%p611_p9), %s482_s3, 4294967168  ;;  %s15_s14 = sadd.s32 1, %s740_s14   ;;  %s877_s9 = smov %s724_s10 }
  0xe8   : > { %p12_p10 = scmp.ge.s32.totalorder %s15_s14, 4   ;;  %s878_s10 = smov %s728_s11 }
  0xe9   : > { %s879_s11 = smov %s810_s22  ;;  %s880_s12 = smov %s736_s13 }
  0xea   : > { %s881_s13 = smov %s883_s17  ;;  %14 = sbr.rel (!%p12_p10) target bundleno = 4 (0x4), region = 67 }
  0xef   :  { %488 = vsyncpa [#allocation3], 1 }
  0xf0   :  { %490 = vsyncpa [#allocation3 + $0x1], 1 }

</bundles_post_ra>
